<compile_context>
chip_gen: v6e
topology: v6e:2x2x1
jax: 0.10.0
libtpu: 0.0.40
codegen_flags: <defaults>
</compile_context>

<pallas_src>
import functools

import jax
import jax.numpy as jnp
from jax import lax
from jax.experimental import pallas as pl
from jax.experimental.pallas import tpu as pltpu

EPS = 1e-5
# MXU operand dtype for weights / dot inputs; accumulation + epilogue are f32.
# Switch to jnp.float32 for an exact-precision validation path.
WEIGHT_DTYPE = jnp.bfloat16


# ---------------------------------------------------------------------------
# Fused trunk kernel: grid=(num_blocks,), one AIR bottleneck per grid step.
# ---------------------------------------------------------------------------
def _air_trunk_kernel(x_ref,
                      wh_ref, sh_ref, th_ref,
                      w3a_ref, s3a_ref, t3a_ref,
                      w3b_ref, s3b_ref, t3b_ref,
                      wf_ref, sf_ref, tf_ref,
                      o_ref, *, H):
    b = pl.program_id(0)

    # Block 0 consumes the kernel input; later blocks consume the previous
    # block's result, which stays resident in VMEM (constant output block index
    # along an "arbitrary" grid axis) -- no HBM round trips between bottlenecks.
    @pl.when(b == 0)
    def _():
        o_ref[...] = x_ref[...]

    x = o_ref[...]                                    # (N*H, W*Cin) f32

    nh = x.shape[0]
    c6w = w3a_ref.shape[-1]                           # W * (planes + planes//2)
    row = lax.broadcasted_iota(jnp.int32, (nh, c6w), 0)
    ok_up = (row % H) != 0                            # row y-1 exists (zero-pad top)
    ok_dn = (row % H) != (H - 1)                      # row y+1 exists (zero-pad bottom)

    def mm(a, w):
        # bf16 only on dot operands; f32 accumulate (MXU-native).
        return jnp.dot(a.astype(WEIGHT_DTYPE), w,
                       preferred_element_type=jnp.float32)

    def conv3x3(v, w3_ref, s_ref, t_ref):
        # v: (N*H, W*C6) f32.  Vertical taps via XLU sublane rolls + boundary
        # masks (no leakage across images in the folded batch axis); horizontal
        # taps are folded into the per-tap banded weight matrices w3_ref[kh].
        v_up = jnp.where(ok_up, pltpu.roll(v, shift=1, axis=0), 0.0)
        v_dn = jnp.where(ok_dn, pltpu.roll(v, shift=nh - 1, axis=0), 0.0)
        y = mm(v_up, w3_ref[0]) + mm(v, w3_ref[1]) + mm(v_dn, w3_ref[2])
        return jnp.maximum(y * s_ref[...] + t_ref[...], 0.0)

    # Packed branch head: [conv1_1 | conv2_1] + [bn1_1 | bn2_1] + ReLU in one dot.
    h = jnp.maximum(mm(x, wh_ref[...]) * sh_ref[...] + th_ref[...], 0.0)
    # Stage A 3x3: block-diag(conv1_2, conv2_2) + [bn_concat[:p] | bn2_2] + ReLU.
    h = conv3x3(h, w3a_ref, s3a_ref, t3a_ref)
    # Stage B 3x3: block-diag(identity, conv2_3) + [identity | bn_concat[p:]] + ReLU.
    h = conv3x3(h, w3b_ref, s3b_ref, t3b_ref)
    # Final 1x1 over the (branch1|branch2) concat, bn, identity residual, ReLU.
    out = mm(h, wf_ref[...]) * sf_ref[...] + tf_ref[...]
    o_ref[...] = jnp.maximum(out + x, 0.0)


_WEIGHT_ORDER = ("wh", "sh", "th", "w3a", "s3a", "t3a",
                 "w3b", "s3b", "t3b", "wf", "sf", "tf")


def air_trunk(x2d, stacked, *, H, W):
    """Run the stacked AIR bottlenecks on x2d laid out as (N*H, W*Cin)."""
    NH, WC = x2d.shape
    nblocks = stacked["wh"].shape[0]
    weights = [stacked[k] for k in _WEIGHT_ORDER]

    def wspec(a):
        nd = a.ndim - 1
        # Block only the leading (per-bottleneck) axis; default double-buffering
        # already hides the ~208 KB/block weight DMA behind the block compute.
        return pl.BlockSpec((None,) + a.shape[1:],
                            lambda blk, _nd=nd: (blk,) + (0,) * _nd)

    act_spec = pl.BlockSpec((NH, WC), lambda blk: (0, 0))
    in_specs = [act_spec] + [wspec(a) for a in weights]

    # Advisory cost: true conv FLOPs (not the zero-padded kron dimensions).
    N = NH // H
    inplanes = WC // W
    planes = inplanes // 4
    p, ph, pc = planes, int(planes * 0.5), int(planes * 1.5)
    pix = N * H * W
    flops_pb = 2 * pix * (inplanes * p + 9 * p * p + inplanes * ph
                          + 2 * 9 * ph * ph + pc * 4 * planes)
    weight_bytes = sum(int(a.size) * a.dtype.itemsize for a in weights)
    cost = pl.CostEstimate(flops=nblocks * flops_pb, transcendentals=0,
                           bytes_accessed=int(weight_bytes + 2 * NH * WC * 4))

    return pl.pallas_call(
        functools.partial(_air_trunk_kernel, H=H),
        out_shape=jax.ShapeDtypeStruct((NH, WC), jnp.float32),
        grid_spec=pltpu.PrefetchScalarGridSpec(
            num_scalar_prefetch=0,
            grid=(nblocks,),
            in_specs=in_specs,
            out_specs=act_spec),
        compiler_params=pltpu.CompilerParams(
            dimension_semantics=("arbitrary",)),   # sequential block-to-block carry
        cost_estimate=cost,
    )(x2d, *weights)


# ---------------------------------------------------------------------------
# Host-side weight preparation: BN folding + packed/banded matmul operands.
# ---------------------------------------------------------------------------
def prepare_air_block(pr, planes, W):
    p = planes
    ph = int(planes * 0.5)
    c6 = p + ph
    eye_w = jnp.eye(W, dtype=jnp.float32)

    def tiled(parts):                    # per-channel pieces -> (1, W*C) row
        v = jnp.concatenate([jnp.asarray(u, jnp.float32).reshape(-1) for u in parts])
        return jnp.tile(v, W).reshape(1, W * v.shape[0])

    def banded_3x3(tap):                 # tap(kh, kw) -> (Cin, Cout); -> (3, W*Cin, W*Cout)
        mats = []
        for kh in range(3):
            m = None
            for kw in range(3):
                band = jnp.eye(W, W, k=1 - kw, dtype=jnp.float32)   # input col w+kw-1
                term = jnp.kron(band, tap(kh, kw))
                m = term if m is None else m + term
            mats.append(m)
        return jnp.stack(mats, axis=0).astype(WEIGHT_DTYPE)

    s11, t11 = pr["bn11"]
    s21, t21 = pr["bn21"]
    s22, t22 = pr["bn22"]
    scat, tcat = pr["bncat"]
    sfin, tfin = pr["bn"]

    # Packed 1x1 head: [conv1_1 | conv2_1] -> (W*Cin, W*c6)
    m1 = pr["w11"].reshape(p, -1).T.astype(jnp.float32)      # (Cin, p)
    m2 = pr["w21"].reshape(ph, -1).T.astype(jnp.float32)     # (Cin, ph)
    wh = jnp.kron(eye_w, jnp.concatenate([m1, m2], axis=1)).astype(WEIGHT_DTYPE)

    zb = jnp.zeros((p, ph), jnp.float32)
    zc = jnp.zeros((ph, p), jnp.float32)

    def tap_a(kh, kw):                   # block-diag(conv1_2, conv2_2) channel tap
        t1 = pr["w12"][:, :, kh, kw].astype(jnp.float32).T   # (p, p)
        t2 = pr["w22"][:, :, kh, kw].astype(jnp.float32).T   # (ph, ph)
        return jnp.block([[t1, zb], [zc, t2]])

    def tap_b(kh, kw):                   # block-diag(identity pass-through, conv2_3)
        t1 = (jnp.eye(p, dtype=jnp.float32) if (kh == 1 and kw == 1)
              else jnp.zeros((p, p), jnp.float32))
        t2 = pr["w23"][:, :, kh, kw].astype(jnp.float32).T
        return jnp.block([[t1, zb], [zc, t2]])

    # Final 1x1: reference concat order (branch1, branch2) == packed channel order.
    wc = pr["wconv"].reshape(4 * p, c6).T.astype(jnp.float32)   # (c6, 4p)
    wf = jnp.kron(eye_w, wc).astype(WEIGHT_DTYPE)

    return dict(
        wh=wh, sh=tiled([s11, s21]), th=tiled([t11, t21]),
        w3a=banded_3x3(tap_a), s3a=tiled([scat[:p], s22]), t3a=tiled([tcat[:p], t22]),
        w3b=banded_3x3(tap_b),
        s3b=tiled([jnp.ones((p,), jnp.float32), scat[p:]]),
        t3b=tiled([jnp.zeros((p,), jnp.float32), tcat[p:]]),
        wf=wf, sf=tiled([sfin]), tf=tiled([tfin]),
    )


# ---------------------------------------------------------------------------
# Parameter init (deterministic synthetic weights; BN folded, inference mode)
# ---------------------------------------------------------------------------
def conv_w(key, cout, cin, kh, kw):
    fan_in = cin * kh * kw
    return jax.random.normal(key, (cout, cin, kh, kw), jnp.float32) * ((2.0 / fan_in) ** 0.5)


def bn_params(key, c):
    k1, k2, k3, k4 = jax.random.split(key, 4)
    gamma = 1.0 + 0.1 * jax.random.normal(k1, (c,), jnp.float32)
    beta = 0.1 * jax.random.normal(k2, (c,), jnp.float32)
    mean = 0.1 * jax.random.normal(k3, (c,), jnp.float32)
    var = 1.0 + 0.1 * jnp.abs(jax.random.normal(k4, (c,), jnp.float32))
    scale = gamma / jnp.sqrt(var + EPS)
    shift = beta - mean * scale
    return scale, shift


def init_air(key, inplanes, planes):
    p = planes
    ph = int(planes * 0.5)
    pc = int(planes * 1.5)
    ks = jax.random.split(key, 11)
    return dict(
        w11=conv_w(ks[0], p, inplanes, 1, 1), bn11=bn_params(ks[1], p),
        w12=conv_w(ks[2], p, p, 3, 3),
        w21=conv_w(ks[3], ph, inplanes, 1, 1), bn21=bn_params(ks[4], ph),
        w22=conv_w(ks[5], ph, ph, 3, 3), bn22=bn_params(ks[6], ph),
        w23=conv_w(ks[7], ph, ph, 3, 3),
        bncat=bn_params(ks[8], pc),
        wconv=conv_w(ks[9], planes * 4, pc, 1, 1),
        bn=bn_params(ks[10], planes * 4),
    )


def init_params(key, inplanes, planes):
    assert inplanes == planes * 4, "identity residual requires inplanes == planes*4"
    ks = jax.random.split(key, 4)
    # Only the blocks reaching the returned tensor are materialized; the
    # down2/mask blocks feed the dead attention branch of the reference forward.
    return {
        "pre_block": init_air(ks[0], inplanes, planes),
        "block1": init_air(ks[1], inplanes, planes),
        "block2": init_air(ks[2], inplanes, planes),
        "pos_block": init_air(ks[3], inplanes, planes),
    }


# ---------------------------------------------------------------------------
# AttentionBlock_C forward
# ---------------------------------------------------------------------------
def attention_block_c_forward(x_nchw, stacked):
    """NCHW in / NCHW out.

    The reference forward returns pos_block(block2(block1(pre_block(x)))): its
    final line `out = self.pos_block(x)` overwrites the attention combine, so the
    maxpool / down2 blocks / bilinear upsample / mask convs / sigmoid sub-graph is
    dead code and is skipped (exactly what jit DCE would do).
    """
    N, C, H, W = x_nchw.shape
    # One layout change per forward to the lane-dense (N*H, W*C) slab; ideally
    # surrounding layers keep this layout end-to-end (perf-review item).
    x2d = jnp.transpose(x_nchw, (0, 2, 3, 1)).reshape(N * H, W * C).astype(jnp.float32)
    y2d = air_trunk(x2d, stacked, H=H, W=W)
    cout = y2d.shape[1] // W
    return jnp.transpose(y2d.reshape(N, H, W, cout), (0, 3, 1, 2))


if __name__ == "__main__":
    inplanes, planes = 16, 4        # identity residual path requires inplanes == planes*4
    N, H, W = 2, 16, 16
    key = jax.random.PRNGKey(0)
    kx, kp = jax.random.split(key)
    x = jax.random.normal(kx, (N, inplanes, H, W), jnp.float32)   # NCHW

    raw = init_params(kp, inplanes, planes)
    order = ("pre_block", "block1", "block2", "pos_block")
    per_block = [prepare_air_block(raw[name], planes, W) for name in order]
    stacked = {k: jnp.stack([bp[k] for bp in per_block], axis=0)
               for k in per_block[0]}

    fwd = jax.jit(attention_block_c_forward)
    out = fwd(x, stacked)
    jax.block_until_ready(out)
    assert out.shape == (N, planes * 4, H, W)
    assert bool(jnp.all(jnp.isfinite(out)))
    print("KERNEL_OK")
</pallas_src>

<mosaic_0001>
module attributes {stable_mosaic.version = 11 : i64} {
  func.func @_air_trunk_kernel(%arg0: i32, %arg1: memref<32x256xf32, #tpu.memory_space<vmem>>, %arg2: memref<1x256x96xbf16, #tpu.memory_space<vmem>>, %arg3: memref<1x1x96xf32, #tpu.memory_space<vmem>>, %arg4: memref<1x1x96xf32, #tpu.memory_space<vmem>>, %arg5: memref<1x3x96x96xbf16, #tpu.memory_space<vmem>>, %arg6: memref<1x1x96xf32, #tpu.memory_space<vmem>>, %arg7: memref<1x1x96xf32, #tpu.memory_space<vmem>>, %arg8: memref<1x3x96x96xbf16, #tpu.memory_space<vmem>>, %arg9: memref<1x1x96xf32, #tpu.memory_space<vmem>>, %arg10: memref<1x1x96xf32, #tpu.memory_space<vmem>>, %arg11: memref<1x96x256xbf16, #tpu.memory_space<vmem>>, %arg12: memref<1x1x256xf32, #tpu.memory_space<vmem>>, %arg13: memref<1x1x256xf32, #tpu.memory_space<vmem>>, %arg14: memref<32x256xf32, #tpu.memory_space<vmem>>) attributes {dimension_semantics = [#tpu.dimension_semantics<arbitrary>], iteration_bounds = array<i64: 4>, scalar_prefetch = 0 : i64, scratch_operands = 0 : i64, tpu.core_type = #tpu.core_type<tc>, window_params = [{pipeline_mode = #tpu.pipeline_mode<synchronous>, transform_indices = @transform_0, window_bounds = array<i64: 32, 256>}, {transform_indices = @transform_1, window_bounds = array<i64: 1, 256, 96>}, {transform_indices = @transform_2, window_bounds = array<i64: 1, 1, 96>}, {transform_indices = @transform_3, window_bounds = array<i64: 1, 1, 96>}, {transform_indices = @transform_4, window_bounds = array<i64: 1, 3, 96, 96>}, {transform_indices = @transform_5, window_bounds = array<i64: 1, 1, 96>}, {transform_indices = @transform_6, window_bounds = array<i64: 1, 1, 96>}, {transform_indices = @transform_7, window_bounds = array<i64: 1, 3, 96, 96>}, {transform_indices = @transform_8, window_bounds = array<i64: 1, 1, 96>}, {transform_indices = @transform_9, window_bounds = array<i64: 1, 1, 96>}, {transform_indices = @transform_10, window_bounds = array<i64: 1, 96, 256>}, {transform_indices = @transform_11, window_bounds = array<i64: 1, 1, 256>}, {transform_indices = @transform_12, window_bounds = array<i64: 1, 1, 256>}, {pipeline_mode = #tpu.pipeline_mode<synchronous>, transform_indices = @transform_13, window_bounds = array<i64: 32, 256>}]} {
    %c0_i32 = arith.constant 0 : i32
    %0 = arith.cmpi eq, %arg0, %c0_i32 : i32
    %1 = arith.extui %0 : i1 to i32
    %c0_i32_0 = arith.constant 0 : i32
    %2 = arith.cmpi ne, %1, %c0_i32_0 : i32
    scf.if %2 {
      %c0_85 = arith.constant 0 : index
      %c0_86 = arith.constant 0 : index
      %131 = vector.load %arg1[%c0_85, %c0_86] : memref<32x256xf32, #tpu.memory_space<vmem>>, vector<32x256xf32>
      %c0_87 = arith.constant 0 : index
      %c0_88 = arith.constant 0 : index
      %132 = vector.load %arg14[%c0_87, %c0_88] : memref<32x256xf32, #tpu.memory_space<vmem>>, vector<32x256xf32>
      tpu.vector_store %arg14[%c0_87, %c0_88], %131 {strides = array<i32>} : memref<32x256xf32, #tpu.memory_space<vmem>>, vector<32x256xf32>,
    } else {
    }
    %c0 = arith.constant 0 : index
    %c0_1 = arith.constant 0 : index
    %3 = vector.load %arg14[%c0, %c0_1] : memref<32x256xf32, #tpu.memory_space<vmem>>, vector<32x256xf32>
    %4 = tpu.iota {dimensions = array<i32: 0>} : vector<32x96xi32>
    %c16_i32 = arith.constant 16 : i32
    %c0_i32_2 = arith.constant 0 : i32
    %5 = arith.cmpi eq, %c16_i32, %c0_i32_2 : i32
    %c1_i32 = arith.constant 1 : i32
    %6 = arith.select %5, %c1_i32, %c16_i32 : i32
    %7 = vector.broadcast %6 : i32 to vector<32x96xi32>
    %8 = arith.remsi %4, %7 : vector<32x96xi32>
    %c0_i32_3 = arith.constant 0 : i32
    %9 = vector.broadcast %c0_i32_3 : i32 to vector<32x96xi32>
    %10 = arith.cmpi ne, %8, %9 : vector<32x96xi32>
    %c0_i32_4 = arith.constant 0 : i32
    %11 = vector.broadcast %c0_i32_4 : i32 to vector<32x96xi32>
    %12 = arith.cmpi slt, %8, %11 : vector<32x96xi32>
    %c0_i32_5 = arith.constant 0 : i32
    %13 = arith.cmpi slt, %6, %c0_i32_5 : i32
    %14 = vector.broadcast %13 : i1 to vector<32x96xi1>
    %15 = vector.broadcast %14 : vector<32x96xi1> to vector<32x96xi1>
    %16 = arith.xori %12, %15 : vector<32x96xi1>
    %17 = arith.andi %16, %10 : vector<32x96xi1>
    %18 = vector.broadcast %6 : i32 to vector<32x96xi32>
    %19 = arith.addi %8, %18 : vector<32x96xi32>
    %20 = arith.select %17, %19, %8 : vector<32x96xi1>, vector<32x96xi32>
    %c0_i32_6 = arith.constant 0 : i32
    %21 = vector.broadcast %c0_i32_6 : i32 to vector<32x96xi32>
    %22 = arith.cmpi ne, %20, %21 : vector<32x96xi32>
    %c16_i32_7 = arith.constant 16 : i32
    %c0_i32_8 = arith.constant 0 : i32
    %23 = arith.cmpi eq, %c16_i32_7, %c0_i32_8 : i32
    %c1_i32_9 = arith.constant 1 : i32
    %24 = arith.select %23, %c1_i32_9, %c16_i32_7 : i32
    %25 = vector.broadcast %24 : i32 to vector<32x96xi32>
    %26 = arith.remsi %4, %25 : vector<32x96xi32>
    %c0_i32_10 = arith.constant 0 : i32
    %27 = vector.broadcast %c0_i32_10 : i32 to vector<32x96xi32>
    %28 = arith.cmpi ne, %26, %27 : vector<32x96xi32>
    %c0_i32_11 = arith.constant 0 : i32
    %29 = vector.broadcast %c0_i32_11 : i32 to vector<32x96xi32>
    %30 = arith.cmpi slt, %26, %29 : vector<32x96xi32>
    %c0_i32_12 = arith.constant 0 : i32
    %31 = arith.cmpi slt, %24, %c0_i32_12 : i32
    %32 = vector.broadcast %31 : i1 to vector<32x96xi1>
    %33 = vector.broadcast %32 : vector<32x96xi1> to vector<32x96xi1>
    %34 = arith.xori %30, %33 : vector<32x96xi1>
    %35 = arith.andi %34, %28 : vector<32x96xi1>
    %36 = vector.broadcast %24 : i32 to vector<32x96xi32>
    %37 = arith.addi %26, %36 : vector<32x96xi32>
    %38 = arith.select %35, %37, %26 : vector<32x96xi1>, vector<32x96xi32>
    %c15_i32 = arith.constant 15 : i32
    %39 = vector.broadcast %c15_i32 : i32 to vector<32x96xi32>
    %40 = arith.cmpi ne, %38, %39 : vector<32x96xi32>
    %c0_13 = arith.constant 0 : index
    %c0_14 = arith.constant 0 : index
    %c0_15 = arith.constant 0 : index
    %41 = vector.load %arg2[%c0_13, %c0_14, %c0_15] : memref<1x256x96xbf16, #tpu.memory_space<vmem>>, vector<1x256x96xbf16>
    %42 = vector.shape_cast %41 : vector<1x256x96xbf16> to vector<256x96xbf16>
    %43 = arith.truncf %3 : vector<32x256xf32> to vector<32x256xbf16>
    %cst = arith.constant dense<0.000000e+00> : vector<32x96xf32>
    %44 = tpu.matmul %43, %42, %cst {dimension_numbers = #tpu.dot_dimension_numbers<[1], [0], [0], [1], [0, 0, 1, 1], [], []>} : vector<32x256xbf16>, vector<256x96xbf16>, vector<32x96xf32> -> vector<32x96xf32>
    %c0_16 = arith.constant 0 : index
    %c0_17 = arith.constant 0 : index
    %c0_18 = arith.constant 0 : index
    %45 = vector.load %arg3[%c0_16, %c0_17, %c0_18] : memref<1x1x96xf32, #tpu.memory_space<vmem>>, vector<1x1x96xf32>
    %46 = vector.shape_cast %45 : vector<1x1x96xf32> to vector<1x96xf32>
    %47 = vector.broadcast %46 : vector<1x96xf32> to vector<32x96xf32>
    %48 = arith.mulf %44, %47 : vector<32x96xf32>
    %c0_19 = arith.constant 0 : index
    %c0_20 = arith.constant 0 : index
    %c0_21 = arith.constant 0 : index
    %49 = vector.load %arg4[%c0_19, %c0_20, %c0_21] : memref<1x1x96xf32, #tpu.memory_space<vmem>>, vector<1x1x96xf32>
    %50 = vector.shape_cast %49 : vector<1x1x96xf32> to vector<1x96xf32>
    %51 = vector.broadcast %50 : vector<1x96xf32> to vector<32x96xf32>
    %52 = arith.addf %48, %51 : vector<32x96xf32>
    %cst_22 = arith.constant 0.000000e+00 : f32
    %53 = vector.broadcast %cst_22 : f32 to vector<32x96xf32>
    %54 = arith.maximumf %52, %53 : vector<32x96xf32>
    %c1_i32_23 = arith.constant 1 : i32
    %55 = tpu.dynamic_rotate %54 by %c1_i32_23 dim 0 : vector<32x96xf32>, i32 -> vector<32x96xf32>
    %cst_24 = arith.constant 0.000000e+00 : f32
    %56 = vector.broadcast %cst_24 : f32 to vector<32x96xf32>
    %57 = arith.select %22, %55, %56 : vector<32x96xi1>, vector<32x96xf32>
    %c31_i32 = arith.constant 31 : i32
    %58 = tpu.dynamic_rotate %54 by %c31_i32 dim 0 : vector<32x96xf32>, i32 -> vector<32x96xf32>
    %cst_25 = arith.constant 0.000000e+00 : f32
    %59 = vector.broadcast %cst_25 : f32 to vector<32x96xf32>
    %60 = arith.select %40, %58, %59 : vector<32x96xi1>, vector<32x96xf32>
    %c0_26 = arith.constant 0 : index
    %c0_27 = arith.constant 0 : index
    %c0_28 = arith.constant 0 : index
    %c0_29 = arith.constant 0 : index
    %61 = vector.load %arg5[%c0_26, %c0_27, %c0_28, %c0_29] : memref<1x3x96x96xbf16, #tpu.memory_space<vmem>>, vector<1x1x96x96xbf16>
    %62 = vector.shape_cast %61 : vector<1x1x96x96xbf16> to vector<96x96xbf16>
    %63 = arith.truncf %57 : vector<32x96xf32> to vector<32x96xbf16>
    %cst_30 = arith.constant dense<0.000000e+00> : vector<32x96xf32>
    %64 = tpu.matmul %63, %62, %cst_30 {dimension_numbers = #tpu.dot_dimension_numbers<[1], [0], [0], [1], [0, 0, 1, 1], [], []>} : vector<32x96xbf16>, vector<96x96xbf16>, vector<32x96xf32> -> vector<32x96xf32>
    %c0_31 = arith.constant 0 : index
    %c1 = arith.constant 1 : index
    %c0_32 = arith.constant 0 : index
    %c0_33 = arith.constant 0 : index
    %65 = vector.load %arg5[%c0_31, %c1, %c0_32, %c0_33] : memref<1x3x96x96xbf16, #tpu.memory_space<vmem>>, vector<1x1x96x96xbf16>
    %66 = vector.shape_cast %65 : vector<1x1x96x96xbf16> to vector<96x96xbf16>
    %67 = arith.truncf %54 : vector<32x96xf32> to vector<32x96xbf16>
    %cst_34 = arith.constant dense<0.000000e+00> : vector<32x96xf32>
    %68 = tpu.matmul %67, %66, %cst_34 {dimension_numbers = #tpu.dot_dimension_numbers<[1], [0], [0], [1], [0, 0, 1, 1], [], []>} : vector<32x96xbf16>, vector<96x96xbf16>, vector<32x96xf32> -> vector<32x96xf32>
    %69 = arith.addf %64, %68 : vector<32x96xf32>
    %c0_35 = arith.constant 0 : index
    %c2 = arith.constant 2 : index
    %c0_36 = arith.constant 0 : index
    %c0_37 = arith.constant 0 : index
    %70 = vector.load %arg5[%c0_35, %c2, %c0_36, %c0_37] : memref<1x3x96x96xbf16, #tpu.memory_space<vmem>>, vector<1x1x96x96xbf16>
    %71 = vector.shape_cast %70 : vector<1x1x96x96xbf16> to vector<96x96xbf16>
    %72 = arith.truncf %60 : vector<32x96xf32> to vector<32x96xbf16>
    %cst_38 = arith.constant dense<0.000000e+00> : vector<32x96xf32>
    %73 = tpu.matmul %72, %71, %cst_38 {dimension_numbers = #tpu.dot_dimension_numbers<[1], [0], [0], [1], [0, 0, 1, 1], [], []>} : vector<32x96xbf16>, vector<96x96xbf16>, vector<32x96xf32> -> vector<32x96xf32>
    %74 = arith.addf %69, %73 : vector<32x96xf32>
    %c0_39 = arith.constant 0 : index
    %c0_40 = arith.constant 0 : index
    %c0_41 = arith.constant 0 : index
    %75 = vector.load %arg6[%c0_39, %c0_40, %c0_41] : memref<1x1x96xf32, #tpu.memory_space<vmem>>, vector<1x1x96xf32>
    %76 = vector.shape_cast %75 : vector<1x1x96xf32> to vector<1x96xf32>
    %77 = vector.broadcast %76 : vector<1x96xf32> to vector<32x96xf32>
    %78 = arith.mulf %74, %77 : vector<32x96xf32>
    %c0_42 = arith.constant 0 : index
    %c0_43 = arith.constant 0 : index
    %c0_44 = arith.constant 0 : index
    %79 = vector.load %arg7[%c0_42, %c0_43, %c0_44] : memref<1x1x96xf32, #tpu.memory_space<vmem>>, vector<1x1x96xf32>
    %80 = vector.shape_cast %79 : vector<1x1x96xf32> to vector<1x96xf32>
    %81 = vector.broadcast %80 : vector<1x96xf32> to vector<32x96xf32>
    %82 = arith.addf %78, %81 : vector<32x96xf32>
    %cst_45 = arith.constant 0.000000e+00 : f32
    %83 = vector.broadcast %cst_45 : f32 to vector<32x96xf32>
    %84 = arith.maximumf %82, %83 : vector<32x96xf32>
    %c1_i32_46 = arith.constant 1 : i32
    %85 = tpu.dynamic_rotate %84 by %c1_i32_46 dim 0 : vector<32x96xf32>, i32 -> vector<32x96xf32>
    %cst_47 = arith.constant 0.000000e+00 : f32
    %86 = vector.broadcast %cst_47 : f32 to vector<32x96xf32>
    %87 = arith.select %22, %85, %86 : vector<32x96xi1>, vector<32x96xf32>
    %c31_i32_48 = arith.constant 31 : i32
    %88 = tpu.dynamic_rotate %84 by %c31_i32_48 dim 0 : vector<32x96xf32>, i32 -> vector<32x96xf32>
    %cst_49 = arith.constant 0.000000e+00 : f32
    %89 = vector.broadcast %cst_49 : f32 to vector<32x96xf32>
    %90 = arith.select %40, %88, %89 : vector<32x96xi1>, vector<32x96xf32>
    %c0_50 = arith.constant 0 : index
    %c0_51 = arith.constant 0 : index
    %c0_52 = arith.constant 0 : index
    %c0_53 = arith.constant 0 : index
    %91 = vector.load %arg8[%c0_50, %c0_51, %c0_52, %c0_53] : memref<1x3x96x96xbf16, #tpu.memory_space<vmem>>, vector<1x1x96x96xbf16>
    %92 = vector.shape_cast %91 : vector<1x1x96x96xbf16> to vector<96x96xbf16>
    %93 = arith.truncf %87 : vector<32x96xf32> to vector<32x96xbf16>
    %cst_54 = arith.constant dense<0.000000e+00> : vector<32x96xf32>
    %94 = tpu.matmul %93, %92, %cst_54 {dimension_numbers = #tpu.dot_dimension_numbers<[1], [0], [0], [1], [0, 0, 1, 1], [], []>} : vector<32x96xbf16>, vector<96x96xbf16>, vector<32x96xf32> -> vector<32x96xf32>
    %c0_55 = arith.constant 0 : index
    %c1_56 = arith.constant 1 : index
    %c0_57 = arith.constant 0 : index
    %c0_58 = arith.constant 0 : index
    %95 = vector.load %arg8[%c0_55, %c1_56, %c0_57, %c0_58] : memref<1x3x96x96xbf16, #tpu.memory_space<vmem>>, vector<1x1x96x96xbf16>
    %96 = vector.shape_cast %95 : vector<1x1x96x96xbf16> to vector<96x96xbf16>
    %97 = arith.truncf %84 : vector<32x96xf32> to vector<32x96xbf16>
    %cst_59 = arith.constant dense<0.000000e+00> : vector<32x96xf32>
    %98 = tpu.matmul %97, %96, %cst_59 {dimension_numbers = #tpu.dot_dimension_numbers<[1], [0], [0], [1], [0, 0, 1, 1], [], []>} : vector<32x96xbf16>, vector<96x96xbf16>, vector<32x96xf32> -> vector<32x96xf32>
    %99 = arith.addf %94, %98 : vector<32x96xf32>
    %c0_60 = arith.constant 0 : index
    %c2_61 = arith.constant 2 : index
    %c0_62 = arith.constant 0 : index
    %c0_63 = arith.constant 0 : index
    %100 = vector.load %arg8[%c0_60, %c2_61, %c0_62, %c0_63] : memref<1x3x96x96xbf16, #tpu.memory_space<vmem>>, vector<1x1x96x96xbf16>
    %101 = vector.shape_cast %100 : vector<1x1x96x96xbf16> to vector<96x96xbf16>
    %102 = arith.truncf %90 : vector<32x96xf32> to vector<32x96xbf16>
    %cst_64 = arith.constant dense<0.000000e+00> : vector<32x96xf32>
    %103 = tpu.matmul %102, %101, %cst_64 {dimension_numbers = #tpu.dot_dimension_numbers<[1], [0], [0], [1], [0, 0, 1, 1], [], []>} : vector<32x96xbf16>, vector<96x96xbf16>, vector<32x96xf32> -> vector<32x96xf32>
    %104 = arith.addf %99, %103 : vector<32x96xf32>
    %c0_65 = arith.constant 0 : index
    %c0_66 = arith.constant 0 : index
    %c0_67 = arith.constant 0 : index
    %105 = vector.load %arg9[%c0_65, %c0_66, %c0_67] : memref<1x1x96xf32, #tpu.memory_space<vmem>>, vector<1x1x96xf32>
    %106 = vector.shape_cast %105 : vector<1x1x96xf32> to vector<1x96xf32>
    %107 = vector.broadcast %106 : vector<1x96xf32> to vector<32x96xf32>
    %108 = arith.mulf %104, %107 : vector<32x96xf32>
    %c0_68 = arith.constant 0 : index
    %c0_69 = arith.constant 0 : index
    %c0_70 = arith.constant 0 : index
    %109 = vector.load %arg10[%c0_68, %c0_69, %c0_70] : memref<1x1x96xf32, #tpu.memory_space<vmem>>, vector<1x1x96xf32>
    %110 = vector.shape_cast %109 : vector<1x1x96xf32> to vector<1x96xf32>
    %111 = vector.broadcast %110 : vector<1x96xf32> to vector<32x96xf32>
    %112 = arith.addf %108, %111 : vector<32x96xf32>
    %cst_71 = arith.constant 0.000000e+00 : f32
    %113 = vector.broadcast %cst_71 : f32 to vector<32x96xf32>
    %114 = arith.maximumf %112, %113 : vector<32x96xf32>
    %c0_72 = arith.constant 0 : index
    %c0_73 = arith.constant 0 : index
    %c0_74 = arith.constant 0 : index
    %115 = vector.load %arg11[%c0_72, %c0_73, %c0_74] : memref<1x96x256xbf16, #tpu.memory_space<vmem>>, vector<1x96x256xbf16>
    %116 = vector.shape_cast %115 : vector<1x96x256xbf16> to vector<96x256xbf16>
    %117 = arith.truncf %114 : vector<32x96xf32> to vector<32x96xbf16>
    %cst_75 = arith.constant dense<0.000000e+00> : vector<32x256xf32>
    %118 = tpu.matmul %117, %116, %cst_75 {dimension_numbers = #tpu.dot_dimension_numbers<[1], [0], [0], [1], [0, 0, 1, 1], [], []>} : vector<32x96xbf16>, vector<96x256xbf16>, vector<32x256xf32> -> vector<32x256xf32>
    %c0_76 = arith.constant 0 : index
    %c0_77 = arith.constant 0 : index
    %c0_78 = arith.constant 0 : index
    %119 = vector.load %arg12[%c0_76, %c0_77, %c0_78] : memref<1x1x256xf32, #tpu.memory_space<vmem>>, vector<1x1x256xf32>
    %120 = vector.shape_cast %119 : vector<1x1x256xf32> to vector<1x256xf32>
    %121 = vector.broadcast %120 : vector<1x256xf32> to vector<32x256xf32>
    %122 = arith.mulf %118, %121 : vector<32x256xf32>
    %c0_79 = arith.constant 0 : index
    %c0_80 = arith.constant 0 : index
    %c0_81 = arith.constant 0 : index
    %123 = vector.load %arg13[%c0_79, %c0_80, %c0_81] : memref<1x1x256xf32, #tpu.memory_space<vmem>>, vector<1x1x256xf32>
    %124 = vector.shape_cast %123 : vector<1x1x256xf32> to vector<1x256xf32>
    %125 = vector.broadcast %124 : vector<1x256xf32> to vector<32x256xf32>
    %126 = arith.addf %122, %125 : vector<32x256xf32>
    %127 = arith.addf %126, %3 : vector<32x256xf32>
    %cst_82 = arith.constant 0.000000e+00 : f32
    %128 = vector.broadcast %cst_82 : f32 to vector<32x256xf32>
    %129 = arith.maximumf %127, %128 : vector<32x256xf32>
    %c0_83 = arith.constant 0 : index
    %c0_84 = arith.constant 0 : index
    %130 = vector.load %arg14[%c0_83, %c0_84] : memref<32x256xf32, #tpu.memory_space<vmem>>, vector<32x256xf32>
    tpu.vector_store %arg14[%c0_83, %c0_84], %129 {strides = array<i32>} : memref<32x256xf32, #tpu.memory_space<vmem>>, vector<32x256xf32>,
    return
  }
  func.func @transform_0(%arg0: i32) -> (i32, i32) {
    %c0_i32 = arith.constant 0 : i32
    %c0_i32_0 = arith.constant 0 : i32
    %c0_i32_1 = arith.constant 0 : i32
    return %c0_i32, %c0_i32_0 : i32, i32
  }
  func.func @transform_1(%arg0: i32) -> (i32, i32, i32) {
    %c0_i32 = arith.constant 0 : i32
    %c0_i32_0 = arith.constant 0 : i32
    %c0_i32_1 = arith.constant 0 : i32
    return %arg0, %c0_i32, %c0_i32_0 : i32, i32, i32
  }
  func.func @transform_2(%arg0: i32) -> (i32, i32, i32) {
    %c0_i32 = arith.constant 0 : i32
    %c0_i32_0 = arith.constant 0 : i32
    %c0_i32_1 = arith.constant 0 : i32
    return %arg0, %c0_i32, %c0_i32_0 : i32, i32, i32
  }
  func.func @transform_3(%arg0: i32) -> (i32, i32, i32) {
    %c0_i32 = arith.constant 0 : i32
    %c0_i32_0 = arith.constant 0 : i32
    %c0_i32_1 = arith.constant 0 : i32
    return %arg0, %c0_i32, %c0_i32_0 : i32, i32, i32
  }
  func.func @transform_4(%arg0: i32) -> (i32, i32, i32, i32) {
    %c0_i32 = arith.constant 0 : i32
    %c0_i32_0 = arith.constant 0 : i32
    %c0_i32_1 = arith.constant 0 : i32
    %c0_i32_2 = arith.constant 0 : i32
    return %arg0, %c0_i32, %c0_i32_0, %c0_i32_1 : i32, i32, i32, i32
  }
  func.func @transform_5(%arg0: i32) -> (i32, i32, i32) {
    %c0_i32 = arith.constant 0 : i32
    %c0_i32_0 = arith.constant 0 : i32
    %c0_i32_1 = arith.constant 0 : i32
    return %arg0, %c0_i32, %c0_i32_0 : i32, i32, i32
  }
  func.func @transform_6(%arg0: i32) -> (i32, i32, i32) {
    %c0_i32 = arith.constant 0 : i32
    %c0_i32_0 = arith.constant 0 : i32
    %c0_i32_1 = arith.constant 0 : i32
    return %arg0, %c0_i32, %c0_i32_0 : i32, i32, i32
  }
  func.func @transform_7(%arg0: i32) -> (i32, i32, i32, i32) {
    %c0_i32 = arith.constant 0 : i32
    %c0_i32_0 = arith.constant 0 : i32
    %c0_i32_1 = arith.constant 0 : i32
    %c0_i32_2 = arith.constant 0 : i32
    return %arg0, %c0_i32, %c0_i32_0, %c0_i32_1 : i32, i32, i32, i32
  }
  func.func @transform_8(%arg0: i32) -> (i32, i32, i32) {
    %c0_i32 = arith.constant 0 : i32
    %c0_i32_0 = arith.constant 0 : i32
    %c0_i32_1 = arith.constant 0 : i32
    return %arg0, %c0_i32, %c0_i32_0 : i32, i32, i32
  }
  func.func @transform_9(%arg0: i32) -> (i32, i32, i32) {
    %c0_i32 = arith.constant 0 : i32
    %c0_i32_0 = arith.constant 0 : i32
    %c0_i32_1 = arith.constant 0 : i32
    return %arg0, %c0_i32, %c0_i32_0 : i32, i32, i32
  }
  func.func @transform_10(%arg0: i32) -> (i32, i32, i32) {
    %c0_i32 = arith.constant 0 : i32
    %c0_i32_0 = arith.constant 0 : i32
    %c0_i32_1 = arith.constant 0 : i32
    return %arg0, %c0_i32, %c0_i32_0 : i32, i32, i32
  }
  func.func @transform_11(%arg0: i32) -> (i32, i32, i32) {
    %c0_i32 = arith.constant 0 : i32
    %c0_i32_0 = arith.constant 0 : i32
    %c0_i32_1 = arith.constant 0 : i32
    return %arg0, %c0_i32, %c0_i32_0 : i32, i32, i32
  }
  func.func @transform_12(%arg0: i32) -> (i32, i32, i32) {
    %c0_i32 = arith.constant 0 : i32
    %c0_i32_0 = arith.constant 0 : i32
    %c0_i32_1 = arith.constant 0 : i32
    return %arg0, %c0_i32, %c0_i32_0 : i32, i32, i32
  }
  func.func @transform_13(%arg0: i32) -> (i32, i32) {
    %c0_i32 = arith.constant 0 : i32
    %c0_i32_0 = arith.constant 0 : i32
    %c0_i32_1 = arith.constant 0 : i32
    return %c0_i32, %c0_i32_0 : i32, i32
  }
}

</mosaic_0001>

<bundles_post_ra>
// kernel: attention_block_c_forward.1
= control target key start
LH: loop header
LB: loop body
LE: loop exit
PB: predicated region body
PF: predicated region fallthrough
CT: control target
= control target key end

     0   :  { %s2464_s25 = smov 0   ;;  %s2856_s0 = inlined_call_operand.vmem [shape: f32[32,256], index: 0, kind: input, shape index: {}]   ;;  %s2857_s1 = inlined_call_operand.vmem [shape: bf16[4,256,96], index: 1, kind: input, shape index: {}]   ;;  %s2858_s2 = inlined_call_operand.vmem [shape: f32[4,1,96], index: 2, kind: input, shape index: {}]   ;;  %s2859_s3 = inlined_call_operand.vmem [shape: f32[4,1,96], index: 3, kind: input, shape index: {}]   ;;  %s2860_s4 = inlined_call_operand.vmem [shape: bf16[4,3,96,96], index: 4, kind: input, shape index: {}]   ;;  %s2861_s5 = inlined_call_operand.vmem [shape: f32[4,1,96], index: 5, kind: input, shape index: {}]   ;;  %s2862_s6 = inlined_call_operand.vmem [shape: f32[4,1,96], index: 6, kind: input, shape index: {}]   ;;  %s2863_s7 = inlined_call_operand.vmem [shape: bf16[4,3,96,96], index: 7, kind: input, shape index: {}]   ;;  %s2864_s8 = inlined_call_operand.vmem [shape: f32[4,1,96], index: 8, kind: input, shape index: {}]   ;;  %s2865_s9 = inlined_call_operand.vmem [shape: f32[4,1,96], index: 9, kind: input, shape index: {}]   ;;  %s2866_s10 = inlined_call_operand.vmem [shape: bf16[4,96,256], index: 10, kind: input, shape index: {}]   ;;  %s2867_s11 = inlined_call_operand.vmem [shape: f32[4,1,256], index: 11, kind: input, shape index: {}]   ;;  %s2868_s12 = inlined_call_operand.vmem [shape: f32[4,1,256], index: 12, kind: input, shape index: {}]   ;;  %s2869_s13 = inlined_call_operand.vmem [shape: f32[32,256], index: 13, kind: output, shape index: {}]  }
   0x1   :  { %2874 = sst [smem:[#allocation3_spill]] %s2856_s0 }
   0x2   :  { %2875 = sst [smem:[#allocation4_spill]] %s2857_s1 }
   0x3   :  { %2876 = sst [smem:[#allocation5_spill]] %s2860_s4 }
   0x4   :  { %2877 = sst [smem:[#allocation6_spill]] %s2869_s13 }
   0x5 LB: > { %2878 = sst [smem:[#allocation2_spill]] %s2391_s25  ;;  %s1985_s26 = sadd.s32 4294967295, %s2391_s25   ;;  %s2391_s25 = sphi %s2464_s25, %s23_s25  }
   0x6   : > { %p1988_p0 = scmp.ge.s32.totalorder %s2391_s25, 1  ;;  %p478_p1 = scmp.lt.s32.totalorder %s2391_s25, 5 }
   0x8   : > { %p479_p2 = pnand %p1988_p0, %p478_p1 }
   0x9   : > { %p558_p3 = scmp.lt.s32.totalorder (!%p479_p2), %s1985_s26, 3  ;;  %s2879_s1 = sld [smem:[#allocation4_spill]] (!%p479_p2) }
   0xa   : > { %482 = sbr.rel (%p479_p2) target bundleno = 967 (0x3c7), region = 72  ;;  %s2880_s4 = sld [smem:[#allocation5_spill]] (!%p479_p2) }
   0xb   : > { %p1996_p4 = scmp.ne.s32.totalorder (!%p479_p2), %s1985_s26, 0 }
   0xf   : > { %s2472_s27 = scalar_select %p558_p3, %s1985_s26, 3 }
  0x10   : > { %s2881_s23 = sld [smem:[#allocation3_spill]] (!%p1996_p4) }
  0x11   : > { %s2131_s28 = sshll.u32 %s2472_s27, 7  ;;  %s2304_s21 = smul.u32 144, %s2472_s27 }
  0x12   : > { %s2482_s17 = scalar_lea.vmem %s2879_s1, %s2131_s28  ;;  %s2305_s13 = smul.u32 96, %s2472_s27 }
  0x13   : > { %s2504_s16 = scalar_lea.vmem %s2880_s4, %s2304_s21  ;;  %s2509_s20 = scalar_lea.vmem %s2863_s7, %s2304_s21 }
  0x14   : > { %s1994_s25 = sshll.u32 %s2472_s27, 1  ;;  %s2520_s29 = scalar_lea.vmem %s2866_s10, %s2305_s13 }
  0x15   : > { %s2525_s28 = scalar_lea.vmem %s2867_s11, %s1994_s25  ;;  %s2530_s21 = scalar_lea.vmem %s2868_s12, %s1994_s25 }
  0x16   : > { %608 = sbr.rel (%p1996_p4) target bundleno = 32 (0x20), region = 76  ;;  %s2882_s4 = sld [smem:[#allocation6_spill]] (!%p1996_p4) }
  0x1b   : > { %v609_v0 = vld [vmem:[%s2881_s23] sm:$0xff]  ;;  %v610_v1 = vld [vmem:[%s2881_s23 + $0x8] sm:$0xff]  ;;  %v611_v2 = vld [vmem:[%s2881_s23 + $0x10] sm:$0xff] }
  0x1c   : > { %617 = vst [vmem:[%s2882_s4] sm:$0xff] %v609_v0  ;;  %618 = vst [vmem:[%s2882_s4 + $0x8] sm:$0xff] %v610_v1  ;;  %v612_v3 = vld [vmem:[%s2881_s23 + $0x18] sm:$0xff]  ;;  %v613_v4 = vld [vmem:[%s2881_s23 + $0x20] sm:$0xff] }
  0x1d   : > { %619 = vst [vmem:[%s2882_s4 + $0x10] sm:$0xff] %v611_v2  ;;  %v614_v5 = vld [vmem:[%s2881_s23 + $0x28] sm:$0xff]  ;;  %620 = vst [vmem:[%s2882_s4 + $0x18] sm:$0xff] %v612_v3  ;;  %v615_v6 = vld [vmem:[%s2881_s23 + $0x30] sm:$0xff] }
  0x1e   : > { %621 = vst [vmem:[%s2882_s4 + $0x20] sm:$0xff] %v613_v4  ;;  %622 = vst [vmem:[%s2882_s4 + $0x28] sm:$0xff] %v614_v5  ;;  %v616_v7 = vld [vmem:[%s2881_s23 + $0x38] sm:$0xff] }
  0x1f   : > { %623 = vst [vmem:[%s2882_s4 + $0x30] sm:$0xff] %v615_v6  ;;  %624 = vst [vmem:[%s2882_s4 + $0x38] sm:$0xff] %v616_v7 }
  0x20 PF: > { %v2315_v8 = vld [vmem:[%s2482_s17 + $0x78] sm:$0xff]   ;;  %v2317_v10 = vld [vmem:[%s2482_s17 + $0x70] sm:$0xff]   ;;  %v2319_v12 = vld [vmem:[%s2482_s17 + $0x68] sm:$0xff]   ;;  %s2883_s25 = sld [smem:[#allocation6_spill]]  ;;  %s2884_s22 = scalar_lea.vmem %s2858_s2, %s2472_s27  ;;  %v633_v53 = vlaneseq  ;;  %vm992_vm0 = vcmask 785408  }
  0x21   : > { %v2316_v9 = vld [vmem:[%s2482_s17 + $0x38] sm:$0xff]   ;;  %2132 = vmatprep.subr.bf16.mxu0 %v2315_v8  ;;  %v2318_v11 = vld [vmem:[%s2482_s17 + $0x30] sm:$0xff]   ;;  %v2320_v13 = vld [vmem:[%s2482_s17 + $0x28] sm:$0xff]   ;;  %s2885_s1 = scalar_lea.vmem %s2859_s3, %s2472_s27  ;;  %s2894_s30 = scalar_lea.vmem %s2861_s5, %s2472_s27 }
  0x22   : > { %2133 = vmatpush3.bf16.msra.mxu0 %v2316_v9  ;;  %v2321_v14 = vld [vmem:[%s2482_s17 + $0x60] sm:$0xff]   ;;  %v2323_v16 = vld [vmem:[%s2482_s17 + $0x58] sm:$0xff]   ;;  %v2325_v18 = vld [vmem:[%s2482_s17 + $0x50] sm:$0xff]   ;;  %v2670_v59 = vshrl.u32 %v633_v53, 7  ;;  %s2895_s4 = scalar_lea.vmem %s2862_s6, %s2472_s27  ;;  %s2896_s14 = scalar_lea.vmem %s2864_s8, %s2472_s27 }
  0x23   : > { %2134 = vmatprep.subr.bf16.mxu0 %v2317_v10  ;;  %v2322_v15 = vld [vmem:[%s2482_s17 + $0x20] sm:$0xff]   ;;  %v2324_v17 = vld [vmem:[%s2482_s17 + $0x18] sm:$0xff]   ;;  %v2326_v22 = vld [vmem:[%s2482_s17 + $0x10] sm:$0xff]   ;;  %s2897_s19 = scalar_lea.vmem %s2865_s9, %s2472_s27 }
  0x24   : > { %v2327_v23 = vld [vmem:[%s2482_s17 + $0x48] sm:$0xff]   ;;  %v2329_v25 = vld [vmem:[%s2482_s17 + $0x40] sm:$0xff]   ;;  %v2331_v36 = vld [vmem:[%s2504_s16 + $0x58] sm:$0xff]   ;;  %v635_v2 = vadd.s32 8, %v2670_v59  ;;  %v637_v6 = vadd.s32 24, %v2670_v59  ;;  %vm918_vm1 = vcmp.lt.s32.totalorder %v2670_v59, 7 }
  0x25   : > { %v2328_v24 = vld [vmem:[%s2482_s17 + $0x8] sm:$0xff]   ;;  %v2330_v26 = vld [vmem:[%s2482_s17] sm:$0xff]   ;;  %2208 = vmatprep.subr.bf16.mxu1 %v2331_v36  ;;  %v2332_v37 = vld [vmem:[%s2504_s16 + $0x50] sm:$0xff]   ;;  %vm905_vm3 = vcmp.lt.s32.totalorder %v2670_v59, 1 }
  0x26   : > { %2135 = vmatpush3.bf16.msra.mxu0 %v2318_v11  ;;  %v2594_v19 = vld [vmem:[%s2883_s25 + $0x8] sm:$0xff]  ;;  %v2599_v20 = vld [vmem:[%s2883_s25 + $0x18] sm:$0xff]  ;;  %v2611_v27 = vld [vmem:[%s2883_s25] sm:$0xff]  ;;  %2209 = vmatpush3.bf16.msra.mxu1 %v2331_v36  ;;  %v649_v11 = vand.u32 15, %v635_v2 }
  0x27   : > { %2136 = vmatprep.subr.bf16.mxu0 %v2319_v12  ;;  %v727_v21 = vpack.c.bf16 %v2599_v20, %v2594_v19  ;;  %v2616_v28 = vld [vmem:[%s2883_s25 + $0x10] sm:$0xff]  ;;  %v2621_v29 = vld [vmem:[%s2883_s25 + $0x28] sm:$0xff]  ;;  %v2626_v30 = vld [vmem:[%s2883_s25 + $0x38] sm:$0xff]  ;;  %2210 = vmatprep.subr.bf16.mxu1 %v2332_v37 }
  0x28   : > { %v726_v31 = vpack.c.bf16 %v2616_v28, %v2611_v27  ;;  %v729_v32 = vpack.c.bf16 %v2626_v30, %v2621_v29  ;;  %v2635_v33 = vld [vmem:[%s2883_s25 + $0x20] sm:$0xff]  ;;  %v2640_v34 = vld [vmem:[%s2883_s25 + $0x30] sm:$0xff]  ;;  %v2333_v38 = vld [vmem:[%s2504_s16 + $0x88] sm:$0xff]   ;;  %vm2681_vm2 = vcmp.ne.s32.totalorder %v649_v11, 15 }
  0x29   : > { %858 = vmatprep.mubr.bf16.mxu0 %v727_v21  ;;  %v728_v35 = vpack.c.bf16 %v2640_v34, %v2635_v33  ;;  %v2334_v39 = vld [vmem:[%s2504_s16 + $0x48] sm:$0xff]   ;;  %v2335_v40 = vld [vmem:[%s2504_s16 + $0x80] sm:$0xff]   ;;  %v2337_v42 = vld [vmem:[%s2504_s16 + $0x78] sm:$0xff]  }
  0x2a   : > { %2137 = vmatpush3.bf16.msra.mxu0 %v2320_v13  ;;  %2211 = vmatpush3.bf16.msra.mxu1 %v2332_v37  ;;  %v2336_v41 = vld [vmem:[%s2504_s16 + $0x40] sm:$0xff]   ;;  %v2338_v43 = vld [vmem:[%s2504_s16 + $0x38] sm:$0xff]   ;;  %v2339_v44 = vld [vmem:[%s2504_s16 + $0x70] sm:$0xff]  }
  0x2b   : > { %2138 = vmatprep.subr.bf16.mxu0 %v2321_v14  ;;  %2212 = vmatprep.subr.bf16.mxu1 %v2334_v39  ;;  %v2340_v45 = vld [vmem:[%s2504_s16 + $0x30] sm:$0xff]   ;;  %v2341_v46 = vld [vmem:[%s2504_s16 + $0x68] sm:$0xff]   ;;  %v2343_v48 = vld [vmem:[%s2504_s16 + $0x60] sm:$0xff]   ;;  %v663_v14 = vand.u32 15, %v637_v6 }
  0x2c   : > { %v2656_v47 = vld [vmem:[%s2504_s16 + $0x28] sm:$0xff]   ;;  %v2013_v52 = vld [vmem:[%s2884_s22] ss:$0 sm:$0xff]  ;;  %v2346_v53 = vld [vmem:[%s2504_s16 + $0x10] sm:$0xff]  }
  0x2d   : > { %v2014_v57 = vld [vmem:[%s2885_s1] ss:$0 sm:$0xff]  ;;  %vm2686_vm4 = vcmp.ne.s32.totalorder %v663_v14, 15  ;;  %v2351_v2 = vld [vmem:[%s2509_s20 + $0x28] sm:$0xff]   ;;  %v2355_v6 = vld [vmem:[%s2509_s20 + $0x18] sm:$0xff]  }
  0x2e   : > { %2139 = vmatpush3.bf16.msra.mxu0 %v2322_v15  ;;  %2213 = vmatpush3.bf16.msra.mxu1 %v2334_v39  ;;  %v2360_v11 = vld [vmem:[%s2509_s20] sm:$0xff]  }
  0x2f   : > { %2140 = vmatprep.subr.bf16.mxu0 %v2323_v16  ;;  %2214 = vmatprep.subr.bf16.mxu1 %v2336_v41  ;;  %v642_v16 = vand.u32 15, %v2670_v59 }
  0x31   : > { %vm2692_vm5 = vcmp.ne.s32.totalorder %v642_v16, 0 }
  0x32   : > { %2141 = vmatpush3.bf16.msra.mxu0 %v2324_v17  ;;  %2215 = vmatpush3.bf16.msra.mxu1 %v2336_v41 }
  0x33   : > { %2142 = vmatprep.subr.bf16.mxu0 %v2325_v18  ;;  %2216 = vmatprep.subr.bf16.mxu1 %v2338_v43 }
  0x36   : > { %2143 = vmatpush3.bf16.msra.mxu0 %v2326_v22  ;;  %2217 = vmatpush3.bf16.msra.mxu1 %v2338_v43  ;;  %v2365_v22 = vld [vmem:[%s2509_s20 + $0x68] sm:$0xff]  }
  0x37   : > { %2144 = vmatprep.subr.bf16.mxu0 %v2327_v23  ;;  %2218 = vmatprep.subr.bf16.mxu1 %v2340_v45 }
  0x3a   : > { %2145 = vmatpush3.bf16.msra.mxu0 %v2328_v24  ;;  %2219 = vmatpush3.bf16.msra.mxu1 %v2340_v45  ;;  %v2375_v24 = vld [vmem:[%s2520_s29 + $0x34] ss:$8 sps:$4 sm:$0xff]  }
  0x3b   : > { %2146 = vmatprep.subr.bf16.mxu0 %v2329_v25  ;;  %2224 = vmatprep.subr.bf16.mxu1 %v2656_v47 }
  0x3e   : > { %2147 = vmatpush3.bf16.msra.mxu0 %v2330_v26 }
  0x3f   : > { %2240 = vmatprep.subr.bf16.mxu0 %v2333_v38 }
  0x41   : > { %859 = vmatmul.mubr.bf16.vlgmr.msra.gmra.mxu0 %v726_v31 }
  0x42   : > { %866 = vmatprep.mubr.bf16.mxu0 %v729_v32  ;;  %2241 = vmatpush3.bf16.msra.mxu0 %v2333_v38 }
  0x43   : > { %2242 = vmatprep.subr.bf16.mxu0 %v2335_v40 }
  0x46   : > { %2243 = vmatpush3.bf16.msra.mxu0 %v2335_v40 }
  0x47   : > { %2244 = vmatprep.subr.bf16.mxu0 %v2337_v42 }
  0x49   : > { %867 = vmatmul.mubr.bf16.gmra.mxu0 %v728_v35 }
  0x4a   : > { %2245 = vmatpush3.bf16.msra.mxu0 %v2337_v42  ;;  %v2344_v42 = vld [vmem:[%s2504_s16 + $0x20] sm:$0xff]  }
  0x4b   : > { %2246 = vmatprep.subr.bf16.mxu0 %v2339_v44 }
  0x4e   : > { %2247 = vmatpush3.bf16.msra.mxu0 %v2339_v44 }
  0x4f   : > { %2248 = vmatprep.subr.bf16.mxu0 %v2341_v46 }
  0x52   : > { %2249 = vmatpush3.bf16.msra.mxu0 %v2341_v46 }
  0x53   : > { %2250 = vmatprep.subr.bf16.mxu0 %v2343_v48 }
  0x56   : > { %2251 = vmatpush3.bf16.msra.mxu0 %v2343_v48 }
  0x57   : > { %2272 = vmatprep.subr.bf16.mxu0 %v2351_v2 }
 0x101   : > { %v2148_v49 = vpop.f32.mrf.mxu0 }
 0x103   : > { %v2149_v50 = vpop.f32.mrf.mxu0 }
 0x104   : > { %v2150_v51 = vadd.f32 %v2149_v50, %v2148_v49 }
 0x105   : > { %v2151_v54 = vpop.f32.mrf.mxu0 }
 0x106   : > { %v882_v55 = vmul.f32 %v2150_v51, %v2013_v52 }
 0x107   : > { %v2152_v56 = vpop.f32.mrf.mxu0 }
 0x108   : > { %v2153_v58 = vadd.f32 %v2152_v56, %v2151_v54  ;;  %v893_v62 = vadd.f32 %v2014_v57, %v882_v55  ;;  %v636_v54 = vadd.s32 16, %v2670_v59  ;;  %v2348_v56 = vld [vmem:[%s2504_s16] sm:$0xff]  }
 0x109   : > { %v2154_v60 = vpop.f32.mrf.mxu0 }
 0x10a   : > { %v883_v61 = vmul.f32 %v2153_v58, %v2013_v52  ;;  %v897_v7 = vmax.f32 %v893_v62, 0.0  ;;  %v2364_v58 = vld [vmem:[%s2509_s20 + $0x70] sm:$0xff]  }
 0x10b   : > { %v2155_v63 = vpop.f32.mrf.mxu0 }
 0x10c   : > { %v894_v0 = vadd.f32 %v2014_v57, %v883_v61  ;;  %v2156_v1 = vadd.f32 %v2155_v63, %v2154_v60  ;;  %v914_v23 = vrot.slane %v897_v7, 1  ;;  %v901_v32 = vrot.slane %v897_v7, 7 }
 0x10d   : > { %v2157_v3 = vpop.f32.mrf.mxu0 }
 0x10e   : > { %v2673_v4 = vmax.f32 %v894_v0, 0.0  ;;  %v884_v5 = vmul.f32 %v2156_v1, %v2013_v52  ;;  %v2349_v0 = vld [vmem:[%s2509_s20 + $0x58] sm:$0xff]   ;;  %v2350_v1 = vld [vmem:[%s2509_s20 + $0x50] sm:$0xff]  }
 0x10f   : > { %v2158_v8 = vpop.f32.mrf.mxu0 }
 0x110   : > { %v895_v9 = vadd.f32 %v2014_v57, %v884_v5  ;;  %v2159_v10 = vadd.f32 %v2158_v8, %v2157_v3  ;;  %v954_v12 = vpack.c.bf16 %v2673_v4, %v897_v7  ;;  %v915_v17 = vrot.slane %v2673_v4, 1  ;;  %v2352_v3 = vld [vmem:[%s2509_s20 + $0x48] sm:$0xff]   ;;  %v2354_v5 = vld [vmem:[%s2509_s20 + $0x40] sm:$0xff]   ;;  %v2356_v7 = vld [vmem:[%s2509_s20 + $0x38] sm:$0xff]  }
 0x111   : > { %v902_v35 = vrot.slane %v2673_v4, 7  ;;  %v2353_v4 = vld [vmem:[%s2509_s20 + $0x20] sm:$0xff]   ;;  %v2357_v8 = vld [vmem:[%s2509_s20 + $0x10] sm:$0xff]  }
 0x112   : > { %v899_v13 = vmax.f32 %v895_v9, 0.0  ;;  %v885_v15 = vmul.f32 %v2159_v10, %v2013_v52  ;;  %2220 = vmatprep.mubr.msk.bf16.mxu1 %vm992_vm0, %v954_v12  ;;  %v921_v36 = vsel %vm918_vm1, %v914_v23, %v915_v17  ;;  %v2345_v52 = vld [vmem:[%s2504_s16 + $0x18] sm:$0xff]   ;;  %v2358_v9 = vld [vmem:[%s2509_s20 + $0x30] sm:$0xff]   ;;  %v2359_v10 = vld [vmem:[%s2509_s20 + $0x8] sm:$0xff]  }
 0x113   : > { %v908_v48 = vsel %vm905_vm3, %v901_v32, %v902_v35  ;;  %v2361_v12 = vld [vmem:[%s2509_s20 + $0x88] sm:$0xff]  }
 0x114   : > { %v916_v18 = vrot.slane %v899_v13, 1  ;;  %v896_v21 = vadd.f32 %v2014_v57, %v885_v15  ;;  %v903_v55 = vrot.slane %v899_v13, 7  ;;  %v656_v57 = vand.u32 15, %v636_v54 }
 0x116   : > { %v900_v25 = vmax.f32 %v896_v21, 0.0  ;;  %v920_v26 = vsel %vm918_vm1, %v915_v17, %v916_v18  ;;  %vm2724_vm6 = vcmp.ne.s32.totalorder %v656_v57, 0  ;;  %v907_v60 = vsel %vm905_vm3, %v902_v35, %v903_v55 }
 0x117   : > { %v924_v37 = vsel %vm2681_vm2, %v920_v26, 0.0  ;;  %v912_v62 = vsel %vm2724_vm6, %v907_v60, 0.0 }
 0x118   : > { %v904_v38 = vrot.slane %v900_v25, 7  ;;  %v917_v39 = vrot.slane %v900_v25, 1  ;;  %v955_v40 = vpack.c.bf16 %v900_v25, %v899_v13  ;;  %v1152_v41 = vpack.c.bf16 %v924_v37, %v921_v36  ;;  %v2063_v25 = vld [vmem:[%s2894_s30] ss:$0 sm:$0xff] }
 0x11a   : > { %v919_v43 = vsel %vm918_vm1, %v916_v18, %v917_v39  ;;  %v922_v44 = vsel %vm918_vm1, %v917_v39, %v914_v23  ;;  %2221 = vmatmul.mubr.msk.bf16.vlgmr.msra.gmra.mxu1 %vm992_vm0, %v955_v40  ;;  %2252 = vmatprep.mubr.msk.bf16.mxu0 %vm992_vm0, %v1152_v41  ;;  %v909_v45 = vsel %vm905_vm3, %v904_v38, %v901_v32  ;;  %v2064_v41 = vld [vmem:[%s2895_s4] ss:$0 sm:$0xff] }
 0x11b   : > { %v926_v46 = vsel %vm2686_vm4, %v922_v44, 0.0  ;;  %2225 = vmatpush3.bf16.msra.mxu1 %v2656_v47  ;;  %v910_v49 = vsel %vm2692_vm5, %v909_v45, 0.0  ;;  %v2347_v47 = vld [vmem:[%s2504_s16 + $0x8] sm:$0xff]   ;;  %v906_v61 = vsel %vm905_vm3, %v903_v55, %v904_v38 }
 0x11c   : > { %v1153_v50 = vpack.c.bf16 %v926_v46, %v919_v43  ;;  %2226 = vmatprep.subr.bf16.mxu1 %v2344_v42  ;;  %v939_v51 = vpack.c.bf16 %v908_v48, %v910_v49  ;;  %v940_v63 = vpack.c.bf16 %v906_v61, %v912_v62 }
 0x11e   : > { %2236 = vmatprep.mubr.msk.bf16.mxu1 %vm992_vm0, %v939_v51  ;;  %2253 = vmatmul.mubr.msk.bf16.vlgmr.msra.gmra.mxu0 %vm992_vm0, %v1153_v50 }
 0x11f   : > { %2227 = vmatpush3.bf16.msra.mxu1 %v2344_v42  ;;  %2273 = vmatpush3.bf16.msra.mxu0 %v2351_v2 }
 0x120   : > { %2228 = vmatprep.subr.bf16.mxu1 %v2345_v52  ;;  %2274 = vmatprep.subr.bf16.mxu0 %v2353_v4 }
 0x123   : > { %2229 = vmatpush3.bf16.msra.mxu1 %v2345_v52  ;;  %2275 = vmatpush3.bf16.msra.mxu0 %v2353_v4 }
 0x124   : > { %2230 = vmatprep.subr.bf16.mxu1 %v2346_v53  ;;  %2276 = vmatprep.subr.bf16.mxu0 %v2355_v6 }
 0x127   : > { %2231 = vmatpush3.bf16.msra.mxu1 %v2346_v53  ;;  %2277 = vmatpush3.bf16.msra.mxu0 %v2355_v6 }
 0x128   : > { %2232 = vmatprep.subr.bf16.mxu1 %v2347_v47  ;;  %2278 = vmatprep.subr.bf16.mxu0 %v2357_v8 }
 0x12b   : > { %2233 = vmatpush3.bf16.msra.mxu1 %v2347_v47  ;;  %2279 = vmatpush3.bf16.msra.mxu0 %v2357_v8 }
 0x12c   : > { %2234 = vmatprep.subr.bf16.mxu1 %v2348_v56  ;;  %2280 = vmatprep.subr.bf16.mxu0 %v2359_v10 }
 0x12f   : > { %2235 = vmatpush3.bf16.msra.mxu1 %v2348_v56  ;;  %2281 = vmatpush3.bf16.msra.mxu0 %v2359_v10 }
 0x130   : > { %2256 = vmatprep.subr.bf16.mxu1 %v2349_v0  ;;  %2282 = vmatprep.subr.bf16.mxu0 %v2360_v11 }
 0x132   : > { %2237 = vmatmul.mubr.msk.bf16.vlgmr.msra.gmra.mxu1 %vm992_vm0, %v940_v63 }
 0x133   : > { %2257 = vmatpush3.bf16.msra.mxu1 %v2349_v0  ;;  %2283 = vmatpush3.bf16.msra.mxu0 %v2360_v11 }
 0x134   : > { %2258 = vmatprep.subr.bf16.mxu1 %v2350_v1 }
 0x137   : > { %2259 = vmatpush3.bf16.msra.mxu1 %v2350_v1 }
 0x138   : > { %2260 = vmatprep.subr.bf16.mxu1 %v2352_v3 }
 0x13b   : > { %2261 = vmatpush3.bf16.msra.mxu1 %v2352_v3 }
 0x13c   : > { %2262 = vmatprep.subr.bf16.mxu1 %v2354_v5 }
 0x13f   : > { %2263 = vmatpush3.bf16.msra.mxu1 %v2354_v5 }
 0x140   : > { %2264 = vmatprep.subr.bf16.mxu1 %v2356_v7 }
 0x143   : > { %2265 = vmatpush3.bf16.msra.mxu1 %v2356_v7  ;;  %v2362_v7 = vld [vmem:[%s2509_s20 + $0x80] sm:$0xff]  }
 0x144   : > { %2266 = vmatprep.subr.bf16.mxu1 %v2358_v9 }
 0x147   : > { %2267 = vmatpush3.bf16.msra.mxu1 %v2358_v9 }
 0x148   : > { %2288 = vmatprep.subr.bf16.mxu1 %v2361_v12 }
 0x1da   : > { %v2222_v13 = vpop.f32.mrf.mxu1 }
 0x1dc   : > { %v1033_v14 = vpop.f32.mrf.mxu1 }
 0x1de   : > { %v2223_v15 = vpop.f32.mrf.mxu1  ;;  %v2254_v16 = vpop.f32.mrf.mxu0 }
 0x1e0   : > { %v1036_v17 = vpop.f32.mrf.mxu1  ;;  %v1230_v18 = vpop.f32.mrf.mxu0 }
 0x1e2   : > { %v2255_v36 = vpop.f32.mrf.mxu0 }
 0x1e4   : > { %v1233_v46 = vpop.f32.mrf.mxu0 }
 0x1f2   : > { %v2238_v21 = vpop.f32.mrf.mxu1 }
 0x1f3   : > { %v1133_v23 = vadd.f32 %v2238_v21, %v2222_v13  ;;  %v2366_v21 = vld [vmem:[%s2509_s20 + $0x60] sm:$0xff]  }
 0x1f4   : > { %v1124_v26 = vpop.f32.mrf.mxu1 }
 0x1f5   : > { %v1247_v32 = vadd.f32 %v2254_v16, %v1133_v23  ;;  %v1125_v35 = vadd.f32 %v1124_v26, %v1033_v14 }
 0x1f6   : > { %v2239_v37 = vpop.f32.mrf.mxu1 }
 0x1f7   : > { %v1258_v38 = vmul.f32 %v2063_v25, %v1247_v32  ;;  %v1245_v39 = vadd.f32 %v1230_v18, %v1125_v35  ;;  %v1136_v40 = vadd.f32 %v2239_v37, %v2223_v15  ;;  %v2363_v18 = vld [vmem:[%s2509_s20 + $0x78] sm:$0xff]   ;;  %v2372_v37 = vld [vmem:[%s2520_s29 + $0x44] ss:$8 sps:$4 sm:$0xff]  }
 0x1f8   : > { %v1127_v42 = vpop.f32.mrf.mxu1  ;;  %v2367_v35 = vld [vmem:[%s2520_s29 + $0x50] ss:$8 sps:$4 sm:$0xff]  }
 0x1f9   : > { %v1256_v43 = vmul.f32 %v2063_v25, %v1245_v39  ;;  %v1248_v44 = vadd.f32 %v2255_v36, %v1136_v40  ;;  %v1128_v45 = vadd.f32 %v1127_v42, %v1036_v17  ;;  %v1269_v48 = vadd.f32 %v2064_v41, %v1258_v38  ;;  %v2369_v36 = vld [vmem:[%s2520_s29 + $0x54] ss:$8 sps:$4 sm:$0xff]   ;;  %v2370_v38 = vld [vmem:[%s2520_s29 + $0x40] ss:$8 sps:$4 sm:$0xff]   ;;  %v2373_v39 = vld [vmem:[%s2520_s29 + $0x30] ss:$8 sps:$4 sm:$0xff]  }
 0x1fa   : > { %1730 = vmatprep.subr.bf16.mxu0 %v2369_v36  ;;  %v2378_v40 = vld [vmem:[%s2520_s29 + $0x24] ss:$8 sps:$4 sm:$0xff]   ;;  %v2381_v42 = vld [vmem:[%s2520_s29 + $0x14] ss:$8 sps:$4 sm:$0xff]  }
 0x1fb   : > { %v1267_v49 = vadd.f32 %v2064_v41, %v1256_v43  ;;  %v1259_v50 = vmul.f32 %v2063_v25, %v1248_v44  ;;  %v1246_v51 = vadd.f32 %v1233_v46, %v1128_v45  ;;  %v1273_v54 = vmax.f32 %v1269_v48, 0.0  ;;  %v2379_v43 = vld [vmem:[%s2520_s29 + $0x10] ss:$8 sps:$4 sm:$0xff]   ;;  %v2384_v44 = vld [vmem:[%s2520_s29 + $0x4] ss:$8 sps:$4 sm:$0xff]  }
 0x1fc   : > { %v2382_v45 = vld [vmem:[%s2520_s29] ss:$8 sps:$4 sm:$0xff]   ;;  %v2393_v46 = vmov 0  }
 0x1fd   : > { %v1271_v52 = vmax.f32 %v1267_v49, 0.0  ;;  %v1270_v53 = vadd.f32 %v2064_v41, %v1259_v50  ;;  %v1257_v47 = vmul.f32 %v2063_v25, %v1246_v51  ;;  %v1277_v62 = vrot.slane %v1273_v54, 7 }
 0x1fe   : > { %v1289_v63 = vrot.slane %v1273_v54, 1 }
 0x1ff   : > { %v1274_v55 = vmax.f32 %v1270_v53, 0.0  ;;  %v1268_v56 = vadd.f32 %v2064_v41, %v1257_v47  ;;  %v1275_v57 = vrot.slane %v1271_v52, 7  ;;  %v1287_v0 = vrot.slane %v1271_v52, 1  ;;  %v2376_v41 = vld [vmem:[%s2520_s29 + $0x20] ss:$8 sps:$4 sm:$0xff]  }
 0x201   : > { %v1278_v60 = vrot.slane %v1274_v55, 7  ;;  %v1272_v61 = vmax.f32 %v1268_v56, 0.0  ;;  %v1327_v6 = vpack.c.bf16 %v1274_v55, %v1273_v54 }
 0x203   : > { %v1282_v1 = vsel %vm905_vm3, %v1278_v60, %v1275_v57  ;;  %v1276_v2 = vrot.slane %v1272_v61, 7  ;;  %v1288_v3 = vrot.slane %v1272_v61, 1  ;;  %v1326_v4 = vpack.c.bf16 %v1272_v61, %v1271_v52  ;;  %v2113_v61 = vld [vmem:[%s2896_s14] ss:$0 sm:$0xff] }
 0x204   : > { %v1283_v5 = vsel %vm2692_vm5, %v1282_v1, 0.0  ;;  %v1279_v13 = vsel %vm905_vm3, %v1277_v62, %v1278_v60 }
 0x205   : > { %2268 = vmatprep.mubr.msk.bf16.mxu1 %vm992_vm0, %v1326_v4  ;;  %v1281_v8 = vsel %vm905_vm3, %v1275_v57, %v1276_v2  ;;  %v1280_v9 = vsel %vm905_vm3, %v1276_v2, %v1277_v62  ;;  %v1292_v10 = vsel %vm918_vm1, %v1288_v3, %v1289_v63  ;;  %v1293_v11 = vsel %vm918_vm1, %v1287_v0, %v1288_v3 }
 0x206   : > { %2269 = vmatmul.mubr.msk.bf16.vlgmr.msra.gmra.mxu1 %vm992_vm0, %v1327_v6  ;;  %v1311_v31 = vpack.c.bf16 %v1281_v8, %v1283_v5  ;;  %v1285_v14 = vsel %vm2724_vm6, %v1280_v9, 0.0  ;;  %v1296_v15 = vsel %vm2681_vm2, %v1292_v10, 0.0  ;;  %v2114_v6 = vld [vmem:[%s2897_s19] ss:$0 sm:$0xff] }
 0x207   : > { %2289 = vmatpush3.bf16.msra.mxu1 %v2361_v12  ;;  %v1312_v16 = vpack.c.bf16 %v1279_v13, %v1285_v14  ;;  %v1523_v17 = vpack.c.bf16 %v1296_v15, %v1293_v11  ;;  %v1290_v12 = vrot.slane %v1274_v55, 1 }
 0x208   : > { %2284 = vmatprep.mubr.msk.bf16.mxu0 %vm992_vm0, %v1311_v31  ;;  %2290 = vmatprep.subr.bf16.mxu1 %v2362_v7 }
 0x209   : > { %2285 = vmatmul.mubr.msk.bf16.vlgmr.msra.gmra.mxu0 %vm992_vm0, %v1312_v16  ;;  %2300 = vmatprep.mubr.msk.bf16.mxu1 %vm992_vm0, %v1523_v17  ;;  %v1294_v23 = vsel %vm918_vm1, %v1290_v12, %v1287_v0  ;;  %v1291_v25 = vsel %vm918_vm1, %v1289_v63, %v1290_v12  ;;  %v1783_v12 = vsub.s32 0, %v2670_v59 }
 0x20a   : > { %v1298_v26 = vsel %vm2686_vm4, %v1294_v23, 0.0  ;;  %1731 = vmatpush1.bf16.msra.mxu0 %v2367_v35  ;;  %1758 = vmatprep.mubr.bf16.mxu0 %v2393_v46  ;;  %v1787_v23 = vsub.s32 1, %v2670_v59 }
 0x20b   : > { %2291 = vmatpush3.bf16.msra.mxu1 %v2362_v7  ;;  %v1524_v32 = vpack.c.bf16 %v1298_v26, %v1291_v25  ;;  %1732 = vmatprep.subr.bf16.mxu0 %v2372_v37  ;;  %v1799_v25 = vld [vmem:[%s2530_s21] sm:$0x3] }
 0x20c   : > { %2292 = vmatprep.subr.bf16.mxu1 %v2363_v18 }
 0x20e   : > { %1733 = vmatpush1.bf16.msra.mxu0 %v2370_v38  ;;  %v1808_v38 = vrot.slane %v1799_v25, %v1787_v23 }
 0x20f   : > { %2293 = vmatpush3.bf16.msra.mxu1 %v2363_v18  ;;  %1734 = vmatprep.subr.bf16.mxu0 %v2375_v24 }
 0x210   : > { %2294 = vmatprep.subr.bf16.mxu1 %v2364_v58 }
 0x212   : > { %1735 = vmatpush1.bf16.msra.mxu0 %v2373_v39 }
 0x213   : > { %2295 = vmatpush3.bf16.msra.mxu1 %v2364_v58  ;;  %1736 = vmatprep.subr.bf16.mxu0 %v2378_v40 }
 0x214   : > { %2296 = vmatprep.subr.bf16.mxu1 %v2365_v22 }
 0x216   : > { %1737 = vmatpush1.bf16.msra.mxu0 %v2376_v41 }
 0x217   : > { %2297 = vmatpush3.bf16.msra.mxu1 %v2365_v22  ;;  %1738 = vmatprep.subr.bf16.mxu0 %v2381_v42 }
 0x218   : > { %2298 = vmatprep.subr.bf16.mxu1 %v2366_v21 }
 0x21a   : > { %1739 = vmatpush1.bf16.msra.mxu0 %v2379_v43 }
 0x21b   : > { %2299 = vmatpush3.bf16.msra.mxu1 %v2366_v21  ;;  %1740 = vmatprep.subr.bf16.mxu0 %v2384_v44  ;;  %v1779_v21 = vld [vmem:[%s2525_s28] sm:$0x3] }
 0x21c   : > { %v1784_v26 = vrot.slane %v1779_v21, %v1783_v12  ;;  %v1788_v35 = vrot.slane %v1779_v21, %v1787_v23 }
 0x21e   : > { %2301 = vmatmul.mubr.msk.bf16.vlgmr.msra.gmra.mxu1 %vm992_vm0, %v1524_v32  ;;  %1741 = vmatpush1.bf16.msra.mxu0 %v2382_v45  ;;  %v1804_v32 = vrot.slane %v1799_v25, %v1783_v12 }
 0x2c6   : > { %v2270_v48 = vpop.f32.mrf.mxu1 }
 0x2c8   : > { %v1404_v49 = vpop.f32.mrf.mxu1 }
 0x2c9   : > { %v2286_v50 = vpop.f32.mrf.mxu0 }
 0x2ca   : > { %v2271_v51 = vpop.f32.mrf.mxu1  ;;  %v1504_v3 = vadd.f32 %v2286_v50, %v2270_v48 }
 0x2cb   : > { %v1495_v52 = vpop.f32.mrf.mxu0 }
 0x2cc   : > { %v1407_v53 = vpop.f32.mrf.mxu1  ;;  %v1496_v55 = vadd.f32 %v1495_v52, %v1404_v49 }
 0x2cd   : > { %v2287_v47 = vpop.f32.mrf.mxu0 }
 0x2ce   : > { %v1507_v63 = vadd.f32 %v2287_v47, %v2271_v51 }
 0x2cf   : > { %v1498_v56 = vpop.f32.mrf.mxu0 }
 0x2d0   : > { %v1499_v0 = vadd.f32 %v1498_v56, %v1407_v53 }
 0x2de   : > { %v2302_v54 = vpop.f32.mrf.mxu1 }
 0x2df   : > { %v1618_v7 = vadd.f32 %v2302_v54, %v1504_v3 }
 0x2e0   : > { %v1601_v57 = vpop.f32.mrf.mxu1 }
 0x2e1   : > { %v1616_v60 = vadd.f32 %v1601_v57, %v1496_v55  ;;  %v1629_v31 = vmul.f32 %v2113_v61, %v1618_v7 }
 0x2e2   : > { %v2303_v62 = vpop.f32.mrf.mxu1 }
 0x2e3   : > { %v1627_v1 = vmul.f32 %v2113_v61, %v1616_v60  ;;  %v1619_v4 = vadd.f32 %v2303_v62, %v1507_v63  ;;  %v1640_v17 = vadd.f32 %v2114_v6, %v1629_v31 }
 0x2e4   : > { %v1604_v2 = vpop.f32.mrf.mxu1 }
 0x2e5   : > { %v1617_v5 = vadd.f32 %v1604_v2, %v1499_v0  ;;  %v1638_v8 = vadd.f32 %v2114_v6, %v1627_v1  ;;  %v1630_v10 = vmul.f32 %v2113_v61, %v1619_v4  ;;  %v1644_v58 = vmax.f32 %v1640_v17, 0.0 }
 0x2e7   : > { %v1628_v9 = vmul.f32 %v2113_v61, %v1617_v5  ;;  %v1642_v13 = vmax.f32 %v1638_v8, 0.0  ;;  %v1641_v15 = vadd.f32 %v2114_v6, %v1630_v10 }
 0x2e9   : > { %v1639_v11 = vadd.f32 %v2114_v6, %v1628_v9  ;;  %v1645_v18 = vmax.f32 %v1641_v15, 0.0 }
 0x2eb   : > { %v1643_v14 = vmax.f32 %v1639_v11, 0.0  ;;  %v1659_v22 = vpack.c.bf16 %v1645_v18, %v1644_v58 }
 0x2ed   : > { %v1658_v16 = vpack.c.bf16 %v1643_v14, %v1642_v13 }
 0x2ef   : > { %2127 = vmatmul.mubr.msk.bf16.vlgmr.msra.gmra.mxu0 %vm992_vm0, %v1658_v16 }
 0x2f0   : > { %1768 = vmatprep.mubr.bf16.mxu0 %v2393_v46 }
 0x2f7   : > { %2128 = vmatmul.mubr.msk.bf16.gmra.mxu0 %vm992_vm0, %v1659_v22 }
 0x3af   : > { %v1760_v36 = vpop.f32.mrf.mxu0 }
 0x3b0   : > { %v1791_v37 = vmul.f32 %v1784_v26, %v1760_v36 }
 0x3b1   : > { %v1762_v24 = vpop.f32.mrf.mxu0 }
 0x3b2   : > { %v1811_v39 = vadd.f32 %v1804_v32, %v1791_v37  ;;  %v1792_v40 = vmul.f32 %v1788_v35, %v1762_v24 }
 0x3b3   : > { %v1764_v41 = vpop.f32.mrf.mxu0 }
 0x3b4   : > { %v1819_v42 = vadd.f32 %v1811_v39, %v2611_v27  ;;  %v1812_v43 = vadd.f32 %v1808_v38, %v1792_v40  ;;  %v1793_v44 = vmul.f32 %v1784_v26, %v1764_v41 }
 0x3b5   : > { %v1766_v45 = vpop.f32.mrf.mxu0 }
 0x3b6   : > { %v1827_v46 = vmax.f32 %v1819_v42, 0.0  ;;  %v1820_v48 = vadd.f32 %v1812_v43, %v2594_v19  ;;  %v1813_v59 = vadd.f32 %v1804_v32, %v1793_v44  ;;  %v1794_v49 = vmul.f32 %v1788_v35, %v1766_v45 }
 0x3b7   : > { %v1770_v50 = vpop.f32.mrf.mxu0 }
 0x3b8   : > { %1835 = vst [vmem:[%s2883_s25] sm:$0xff] %v1827_v46  ;;  %v1828_v51 = vmax.f32 %v1820_v48, 0.0  ;;  %v1821_v52 = vadd.f32 %v1813_v59, %v2616_v28  ;;  %v1814_v53 = vadd.f32 %v1808_v38, %v1794_v49  ;;  %v1795_v47 = vmul.f32 %v1784_v26, %v1770_v50 }
 0x3b9   : > { %v1772_v54 = vpop.f32.mrf.mxu0 }
 0x3ba   : > { %1836 = vst [vmem:[%s2883_s25 + $0x8] sm:$0xff] %v1828_v51  ;;  %v1829_v27 = vmax.f32 %v1821_v52, 0.0  ;;  %v1822_v19 = vadd.f32 %v1814_v53, %v2599_v20  ;;  %v1815_v55 = vadd.f32 %v1804_v32, %v1795_v47  ;;  %v1796_v56 = vmul.f32 %v1788_v35, %v1772_v54 }
 0x3bb   : > { %v1774_v57 = vpop.f32.mrf.mxu0 }
 0x3bc   : > { %1837 = vst [vmem:[%s2883_s25 + $0x10] sm:$0xff] %v1829_v27  ;;  %v1830_v60 = vmax.f32 %v1822_v19, 0.0  ;;  %v1823_v28 = vadd.f32 %v1815_v55, %v2635_v33  ;;  %v1816_v61 = vadd.f32 %v1808_v38, %v1796_v56  ;;  %v1797_v62 = vmul.f32 %v1784_v26, %v1774_v57 }
 0x3bd   : > { %v1776_v63 = vpop.f32.mrf.mxu0 }
 0x3be   : > { %1838 = vst [vmem:[%s2883_s25 + $0x18] sm:$0xff] %v1830_v60  ;;  %v1831_v0 = vmax.f32 %v1823_v28, 0.0  ;;  %v1824_v20 = vadd.f32 %v1816_v61, %v2621_v29  ;;  %v1817_v1 = vadd.f32 %v1804_v32, %v1797_v62  ;;  %v1798_v2 = vmul.f32 %v1788_v35, %v1776_v63 }
 0x3c0   : > { %1839 = vst [vmem:[%s2883_s25 + $0x20] sm:$0xff] %v1831_v0  ;;  %v1832_v3 = vmax.f32 %v1824_v20, 0.0  ;;  %v1825_v4 = vadd.f32 %v1817_v1, %v2640_v34  ;;  %v1818_v33 = vadd.f32 %v1808_v38, %v1798_v2 }
 0x3c2   : > { %1840 = vst [vmem:[%s2883_s25 + $0x28] sm:$0xff] %v1832_v3  ;;  %v1833_v5 = vmax.f32 %v1825_v4, 0.0  ;;  %v1826_v6 = vadd.f32 %v1818_v33, %v2626_v30 }
 0x3c4   : > { %1841 = vst [vmem:[%s2883_s25 + $0x30] sm:$0xff] %v1833_v5  ;;  %v1834_v29 = vmax.f32 %v1826_v6, 0.0 }
 0x3c6   : > { %1842 = vst [vmem:[%s2883_s25 + $0x38] sm:$0xff] %v1834_v29 }
 0x3c7 PF: > { %s2898_s26 = sld [smem:[#allocation2_spill]] }
 0x3cd   : > { %s23_s25 = sadd.s32 1, %s2898_s26  }
 0x3ce   : > { %p20_p5 = scmp.ge.s32.totalorder %s23_s25, 6  }
 0x3d0   :  { %22 = sbr.rel (!%p20_p5) target bundleno = 5 (0x5), region = 139 }

</bundles_post_ra>
